<compile_context>
chip_gen: v6e
topology: v6e:2x2x1
jax: 0.10.0
libtpu: 0.0.40
codegen_flags: <defaults>
</compile_context>

<pallas_src>
import jax
import jax.numpy as jnp
from jax.experimental import pallas as pl
from jax.experimental.pallas import tpu as pltpu


# -----------------------------------------------------------------------------
# Kernel 1: per-tile BN statistics of the deconv output, computed on the fly.
# The deconv output itself is NOT written to HBM here (only x is read).
# -----------------------------------------------------------------------------
def _stats_kernel(x_ref, wt_ref, psum_ref, psq_ref):
    # x_ref : (Cin, hw_tile)   wt_ref : (4*Cout, Cin)
    y = jnp.dot(wt_ref[...], x_ref[...], preferred_element_type=jnp.float32)
    s = jnp.sum(y, axis=1, keepdims=True)        # (4*Cout, 1)  lane reduce
    q = jnp.sum(y * y, axis=1, keepdims=True)    # (4*Cout, 1)
    psum_ref[...] = s.reshape(psum_ref.shape)
    psq_ref[...] = q.reshape(psq_ref.shape)


# -----------------------------------------------------------------------------
# Kernel 2: recompute the deconv and apply the folded BN affine in one pass.
# Output layout (N, 4*Cout, H*W): lane axis = H*W (dense, unmasked stores).
# -----------------------------------------------------------------------------
def _deconv_bn_kernel(x_ref, wt_ref, scale_ref, bias_ref, o_ref):
    # x_ref : (Cin, hw_tile)  wt_ref : (4*Cout, Cin)  scale/bias : (4*Cout, 1)
    y = jnp.dot(wt_ref[...], x_ref[...], preferred_element_type=jnp.float32)
    o_ref[...] = y * scale_ref[...] + bias_ref[...]


def _pick_hw_tile(hw, cin, cout4, budget_bytes):
    """Largest lane-axis (H*W) tile whose double-buffered in+out blocks fit budget."""
    per_col = (cin + cout4) * 4 * 2            # f32, input + output block, 2 buffers
    max_tile = max(128, budget_bytes // per_col)
    if hw <= max_tile:
        return hw
    t = (max_tile // 128) * 128
    while t >= 128:
        if hw % t == 0:                        # keep the (8,128) / exact-tiling rule
            return t
        t -= 128
    return hw                                  # no 128-multiple divisor: full row


# -----------------------------------------------------------------------------
# Wrapper: NCHW in, NCHW out (PyTorch convention).
# -----------------------------------------------------------------------------
def deconv_bn_2(x_nchw, w_deconv, gamma, beta, *, eps=1e-5,
                vmem_budget_bytes=10 << 20):
    N, Cin, H, W = x_nchw.shape
    Cin_w, Cout, KH, KW = w_deconv.shape
    assert (Cin_w, KH, KW) == (Cin, 2, 2)

    HW = H * W
    C4 = KH * KW * Cout

    x3 = x_nchw.reshape(N, Cin, HW)                       # free (row-major view)
    # (Cin, Cout, kh, kw) -> (kh, kw, Cout, Cin) -> (4*Cout, Cin); tiny weight prep.
    wt = jnp.transpose(w_deconv, (2, 3, 1, 0)).reshape(C4, Cin).astype(jnp.float32)

    hw_tile = _pick_hw_tile(HW, Cin, C4, vmem_budget_bytes)
    T = HW // hw_tile
    G = N * T

    cparams = pltpu.CompilerParams(
        dimension_semantics=("parallel", "parallel"),
        vmem_limit_bytes=32 * 1024 * 1024)

    # ---- pass 1: per-tile partial statistics (reads only x) ----------------
    psum, psq = pl.pallas_call(
        _stats_kernel,
        out_shape=(jax.ShapeDtypeStruct((G, C4, 1), jnp.float32),
                   jax.ShapeDtypeStruct((G, C4, 1), jnp.float32)),
        grid_spec=pltpu.PrefetchScalarGridSpec(
            num_scalar_prefetch=0,
            grid=(N, T),
            in_specs=[pl.BlockSpec((None, Cin, hw_tile), lambda n, t: (n, 0, t)),
                      pl.BlockSpec((C4, Cin), lambda n, t: (0, 0))],
            out_specs=[pl.BlockSpec((1, C4, 1), lambda n, t: (n * T + t, 0, 0)),
                       pl.BlockSpec((1, C4, 1), lambda n, t: (n * T + t, 0, 0))],
        ),
        compiler_params=cparams,
    )(x3, wt)

    # ---- tiny host-side (XLA) reduction: fold partials -> BN scale / bias --
    count = jnp.float32(N * HW * KH * KW)
    s1 = jnp.sum(psum[..., 0], axis=0).reshape(KH * KW, Cout).sum(axis=0)
    s2 = jnp.sum(psq[..., 0], axis=0).reshape(KH * KW, Cout).sum(axis=0)
    mean = s1 / count
    var = jnp.maximum(s2 / count - mean * mean, 0.0)      # biased var (PyTorch BN)
    inv = jax.lax.rsqrt(var + eps)
    scale_c = gamma.astype(jnp.float32) * inv
    bias_c = beta.astype(jnp.float32) - mean * scale_c
    scale4 = jnp.tile(scale_c, KH * KW).reshape(C4, 1)    # row = (kh,kw,oc), oc fastest
    bias4 = jnp.tile(bias_c, KH * KW).reshape(C4, 1)

    # ---- pass 2: recompute deconv + apply BN affine, lane-dense output -----
    out_raw = pl.pallas_call(
        _deconv_bn_kernel,
        out_shape=jax.ShapeDtypeStruct((N, C4, HW), jnp.float32),
        grid_spec=pltpu.PrefetchScalarGridSpec(
            num_scalar_prefetch=0,
            grid=(N, T),
            in_specs=[pl.BlockSpec((None, Cin, hw_tile), lambda n, t: (n, 0, t)),
                      pl.BlockSpec((C4, Cin), lambda n, t: (0, 0)),
                      pl.BlockSpec((C4, 1), lambda n, t: (0, 0)),
                      pl.BlockSpec((C4, 1), lambda n, t: (0, 0))],
            out_specs=pl.BlockSpec((None, C4, hw_tile), lambda n, t: (n, 0, t)),
        ),
        compiler_params=cparams,
    )(x3, wt, scale4, bias4)

    # single XLA pass: 2x2 patch scatter + NCHW permute fused into one transpose
    out = out_raw.reshape(N, KH, KW, Cout, H, W)
    out = jnp.transpose(out, (0, 3, 4, 1, 5, 2)).reshape(N, Cout, KH * H, KW * W)
    return out


# -----------------------------------------------------------------------------
# Pure-JAX reference (semantics of the PyTorch module's forward, training mode)
# -----------------------------------------------------------------------------
def reference(x, w, gamma, beta, eps=1e-5):
    N, Cin, H, Wd = x.shape
    _, Cout, KH, KW = w.shape
    # ConvTranspose2d(k=2, s=2): out[n,o,2i+k,2j+l] = sum_c x[n,c,i,j] * w[c,o,k,l]
    y = jnp.einsum('ncij,cokl->noikjl', x, w).reshape(N, Cout, KH * H, KW * Wd)
    mean = y.mean(axis=(0, 2, 3), keepdims=True)
    var = ((y - mean) ** 2).mean(axis=(0, 2, 3), keepdims=True)   # biased
    yn = (y - mean) / jnp.sqrt(var + eps)
    return yn * gamma.reshape(1, Cout, 1, 1) + beta.reshape(1, Cout, 1, 1)


if __name__ == "__main__":
    key = jax.random.PRNGKey(0)
    k1, k2, k3, k4 = jax.random.split(key, 4)

    N, Cin, Cout, H, W = 2, 4, 8, 16, 16
    x = jax.random.normal(k1, (N, Cin, H, W), dtype=jnp.float32)
    # ConvTranspose2d weight shape: (in_channel, out_channel, kH, kW)
    w = 0.1 * jax.random.normal(k2, (Cin, Cout, 2, 2), dtype=jnp.float32)
    # BatchNorm2d affine params (perturbed so the affine path is exercised).
    gamma = 1.0 + 0.1 * jax.random.normal(k3, (Cout,), dtype=jnp.float32)
    beta = 0.1 * jax.random.normal(k4, (Cout,), dtype=jnp.float32)

    out = jax.block_until_ready(deconv_bn_2(x, w, gamma, beta))
    ref = reference(x, w, gamma, beta)

    assert out.shape == (N, Cout, 2 * H, 2 * W), out.shape
    assert jnp.allclose(out, ref, atol=2e-2, rtol=2e-2), \
        float(jnp.max(jnp.abs(out - ref)))
    print("KERNEL_OK")
</pallas_src>

<mosaic_0001>
module attributes {stable_mosaic.version = 11 : i64} {
  func.func @_stats_kernel(%arg0: i32, %arg1: i32, %arg2: memref<1x4x256xf32, #tpu.memory_space<vmem>>, %arg3: memref<32x4xf32, #tpu.memory_space<vmem>>, %arg4: memref<1x32x1xf32, #tpu.memory_space<vmem>>, %arg5: memref<1x32x1xf32, #tpu.memory_space<vmem>>) attributes {dimension_semantics = [#tpu.dimension_semantics<parallel>, #tpu.dimension_semantics<parallel>], iteration_bounds = array<i64: 2, 1>, scalar_prefetch = 0 : i64, scratch_operands = 0 : i64, tpu.core_type = #tpu.core_type<tc>, window_params = [{transform_indices = @transform_0, window_bounds = array<i64: 1, 4, 256>}, {pipeline_mode = #tpu.pipeline_mode<synchronous>, transform_indices = @transform_1, window_bounds = array<i64: 32, 4>}, {transform_indices = @transform_2, window_bounds = array<i64: 1, 32, 1>}, {transform_indices = @transform_3, window_bounds = array<i64: 1, 32, 1>}]} {
    %c0 = arith.constant 0 : index
    %c0_0 = arith.constant 0 : index
    %0 = vector.load %arg3[%c0, %c0_0] : memref<32x4xf32, #tpu.memory_space<vmem>>, vector<32x4xf32>
    %c0_1 = arith.constant 0 : index
    %c0_2 = arith.constant 0 : index
    %c0_3 = arith.constant 0 : index
    %1 = vector.load %arg2[%c0_1, %c0_2, %c0_3] : memref<1x4x256xf32, #tpu.memory_space<vmem>>, vector<1x4x256xf32>
    %2 = vector.shape_cast %1 : vector<1x4x256xf32> to vector<4x256xf32>
    %cst = arith.constant dense<0.000000e+00> : vector<32x256xf32>
    %3 = tpu.matmul %0, %2, %cst {dimension_numbers = #tpu.dot_dimension_numbers<[1], [0], [0], [1], [0, 0, 1, 1], [], []>} : vector<32x4xf32>, vector<4x256xf32>, vector<32x256xf32> -> vector<32x256xf32>
    %cst_4 = arith.constant dense<0.000000e+00> : vector<32xf32>
    %4 = vector.multi_reduction <add>, %3, %cst_4 [1] : vector<32x256xf32> to vector<32xf32>
    %5 = vector.shape_cast %4 : vector<32xf32> to vector<32x1xf32>
    %6 = arith.mulf %3, %3 : vector<32x256xf32>
    %cst_5 = arith.constant dense<0.000000e+00> : vector<32xf32>
    %7 = vector.multi_reduction <add>, %6, %cst_5 [1] : vector<32x256xf32> to vector<32xf32>
    %8 = vector.shape_cast %7 : vector<32xf32> to vector<32x1xf32>
    %9 = vector.shape_cast %5 : vector<32x1xf32> to vector<1x32x1xf32>
    %c0_6 = arith.constant 0 : index
    %c0_7 = arith.constant 0 : index
    %c0_8 = arith.constant 0 : index
    %10 = vector.load %arg4[%c0_6, %c0_7, %c0_8] : memref<1x32x1xf32, #tpu.memory_space<vmem>>, vector<1x32x1xf32>
    tpu.vector_store %arg4[%c0_6, %c0_7, %c0_8], %9 {strides = array<i32>} : memref<1x32x1xf32, #tpu.memory_space<vmem>>, vector<1x32x1xf32>,
    %11 = vector.shape_cast %8 : vector<32x1xf32> to vector<1x32x1xf32>
    %c0_9 = arith.constant 0 : index
    %c0_10 = arith.constant 0 : index
    %c0_11 = arith.constant 0 : index
    %12 = vector.load %arg5[%c0_9, %c0_10, %c0_11] : memref<1x32x1xf32, #tpu.memory_space<vmem>>, vector<1x32x1xf32>
    tpu.vector_store %arg5[%c0_9, %c0_10, %c0_11], %11 {strides = array<i32>} : memref<1x32x1xf32, #tpu.memory_space<vmem>>, vector<1x32x1xf32>,
    return
  }
  func.func @transform_0(%arg0: i32, %arg1: i32) -> (i32, i32, i32) {
    %c0_i32 = arith.constant 0 : i32
    %c0_i32_0 = arith.constant 0 : i32
    return %arg0, %c0_i32, %arg1 : i32, i32, i32
  }
  func.func @transform_1(%arg0: i32, %arg1: i32) -> (i32, i32) {
    %c0_i32 = arith.constant 0 : i32
    %c0_i32_0 = arith.constant 0 : i32
    %c0_i32_1 = arith.constant 0 : i32
    return %c0_i32, %c0_i32_0 : i32, i32
  }
  func.func @transform_2(%arg0: i32, %arg1: i32) -> (i32, i32, i32) {
    %c1_i32 = arith.constant 1 : i32
    %0 = arith.muli %arg0, %c1_i32 : i32
    %1 = arith.addi %0, %arg1 : i32
    %c0_i32 = arith.constant 0 : i32
    %c0_i32_0 = arith.constant 0 : i32
    %c0_i32_1 = arith.constant 0 : i32
    return %1, %c0_i32, %c0_i32_0 : i32, i32, i32
  }
  func.func @transform_3(%arg0: i32, %arg1: i32) -> (i32, i32, i32) {
    %c1_i32 = arith.constant 1 : i32
    %0 = arith.muli %arg0, %c1_i32 : i32
    %1 = arith.addi %0, %arg1 : i32
    %c0_i32 = arith.constant 0 : i32
    %c0_i32_0 = arith.constant 0 : i32
    %c0_i32_1 = arith.constant 0 : i32
    return %1, %c0_i32, %c0_i32_0 : i32, i32, i32
  }
}

</mosaic_0001>

<bundles_post_ra>
// kernel: tpu_custom_call.1
= control target key start
LH: loop header
LB: loop body
LE: loop exit
PB: predicated region body
PF: predicated region fallthrough
CT: control target
= control target key end

     0   :  { %s581_s12 = smov 0   ;;  %s583_s13 = smov 0   ;;  %s641_s0 = inlined_call_operand.vmem [shape: f32[2,4,256], index: 0, kind: input, shape index: {}]   ;;  %s642_s1 = inlined_call_operand.vmem [shape: f32[32,4], index: 1, kind: input, shape index: {}]   ;;  %s643_s2 = inlined_call_operand.vmem [shape: f32[2,32,1], index: 2, kind: output, shape index: {0}]   ;;  %s644_s3 = inlined_call_operand.vmem [shape: f32[2,32,1], index: 3, kind: output, shape index: {1}]  }
   0x1   :  { %s585_s14 = smov 0  }
   0x2 LB: > { %s26_s15 = sadd.s32 1, %s554_s13  ;;  %p490_p0 = scmp.ge.s32.totalorder %s558_s14, 1  ;;  %s558_s14 = sphi %s585_s14, %s14_s14   ;;  %s554_s13 = sphi %s583_s13, %s646_s13   ;;  %s550_s12 = sphi %s581_s12, %s645_s12  }
   0x3   : > { %p28_p1 = scmp.ge.s32.totalorder %s26_s15, 2  ;;  %p163_p2 = scmp.lt.s32.totalorder %s558_s14, 3 }
   0x5   : > { %s648_s15 = smov (%p28_p1, %s26_s15), 0  ;;  %p164_p3 = pnand %p490_p0, %p163_p2 }
   0x6   : > { %p199_p4 = scmp.lt.s32.totalorder (!%p164_p3), %s550_s12, 1 }
   0x7   : > { %167 = sbr.rel (%p164_p3) target bundleno = 368 (0x170), region = 28 }
   0xc   : > { %v560_v0 = vmov 0.0   ;;  %s650_s12 = smov (!%p199_p4, %s550_s12), 1  ;;  %vm242_vm0 = vcmask 1043456   ;;  %v222_v3 = vld [vmem:[%s642_s1] sm:$0xff]  ;;  %vm229_vm1 = vcmask 31744   ;;  %v224_v4 = vld [vmem:[%s642_s1 + $0x10] sm:$0xff] }
   0xd   : > { %311 = vmatprep.mubr.f32.mxu0 %v560_v0  ;;  %323 = vmatprep.mubr.f32.mxu1 %v560_v0  ;;  %s505_s16 = sshll.u32 %s650_s12, 3  ;;  %v223_v5 = vld [vmem:[%s642_s1 + $0x8] sm:$0xff]  ;;  %v225_v6 = vld [vmem:[%s642_s1 + $0x18] sm:$0xff]  ;;  %s506_s28 = sshll.u32 %s650_s12, 5  ;;  %vm368_vm2 = vcmask 7168  }
   0xe   : > { %s206_s19 = scalar_lea.vmem %s641_s0, %s505_s16  ;;  %s213_s4 = scalar_lea.vmem %s643_s2, %s506_s28 }
   0xf   : > { %v226_v1 = vld [vmem:[%s206_s19] sm:$0xff]  ;;  %s220_s7 = scalar_lea.vmem %s644_s3, %s506_s28 }
  0x10   : > { %v228_v2 = vcombine.high %v226_v1, %v226_v1 }
  0x12   : > { %497 = vmatprep.subr.msk.mxu0 %vm242_vm0, %v228_v2  ;;  %508 = vmatprep.subr.msk.mxu1 %vm242_vm0, %v228_v2 }
  0x13   : > { %498 = vmatpush1.msk.msra.mxu0 %vm242_vm0, %v226_v1  ;;  %509 = vmatpush1.msk.msra.mxu1 %vm242_vm0, %v226_v1 }
  0x14   : > { %499 = vmatmul.mubr.msk.f32.vlgmr.msra.gmra.mxu0 %vm229_vm1, %v222_v3  ;;  %501 = vmatmul.mubr.msk.f32.vlgmr.msra.gmra.mxu1 %vm229_vm1, %v224_v4 }
  0x15   : > { %317 = vmatprep.mubr.f32.mxu0 %v560_v0  ;;  %329 = vmatprep.mubr.f32.mxu1 %v560_v0 }
  0x18   : > { %500 = vmatmul.mubr.msk.f32.gmra.mxu0 %vm229_vm1, %v223_v5  ;;  %502 = vmatmul.mubr.msk.f32.gmra.mxu1 %vm229_vm1, %v225_v6 }
  0xd4   : > { %v313_v7 = vpop.f32.mrf.mxu0  ;;  %v325_v8 = vpop.f32.mrf.mxu1 }
  0xd5   : > { %v348_v16 = vmul.f32 %v313_v7, %v313_v7  ;;  %v352_v27 = vmul.f32 %v325_v8, %v325_v8 }
  0xd6   : > { %v315_v9 = vpop.f32.mrf.mxu0  ;;  %v327_v10 = vpop.f32.mrf.mxu1 }
  0xd7   : > { %v349_v11 = vmul.f32 %v315_v9, %v315_v9  ;;  %v342_v12 = vadd.f32 %v327_v10, %v325_v8  ;;  %v336_v13 = vadd.f32 %v315_v9, %v313_v7  ;;  %v353_v23 = vmul.f32 %v327_v10, %v327_v10 }
  0xd8   : > { %v319_v14 = vpop.f32.mrf.mxu0  ;;  %v331_v15 = vpop.f32.mrf.mxu1 }
  0xd9   : > { %343 = vadd.xlane.f32.xlu1 %v342_v12  ;;  %337 = vadd.xlane.f32.xlu0 %v336_v13  ;;  %v350_v19 = vmul.f32 %v319_v14, %v319_v14  ;;  %v356_v22 = vadd.f32 %v349_v11, %v348_v16  ;;  %v354_v28 = vmul.f32 %v331_v15, %v331_v15 }
  0xda   : > { %v321_v17 = vpop.f32.mrf.mxu0  ;;  %v333_v18 = vpop.f32.mrf.mxu1  ;;  %v362_v30 = vadd.f32 %v353_v23, %v352_v27 }
  0xdb   : > { %v351_v20 = vmul.f32 %v321_v17, %v321_v17  ;;  %v345_v21 = vadd.f32 %v333_v18, %v331_v15  ;;  %v339_v24 = vadd.f32 %v321_v17, %v319_v14  ;;  %v355_v25 = vmul.f32 %v333_v18, %v333_v18 }
  0xdd   : > { %346 = vadd.xlane.f32.xlu1 %v345_v21  ;;  %357 = vadd.xlane.f32.xlu0 %v356_v22  ;;  %v359_v26 = vadd.f32 %v351_v20, %v350_v19  ;;  %v365_v29 = vadd.f32 %v355_v25, %v354_v28 }
  0xe1   : > { %360 = vadd.xlane.f32.xlu1 %v359_v26  ;;  %340 = vadd.xlane.f32.xlu0 %v339_v24 }
  0xe5   : > { %366 = vadd.xlane.f32.xlu1 %v365_v29  ;;  %363 = vadd.xlane.f32.xlu0 %v362_v30 }
 0x162   : > { %v344_v31 = vpop.xlane.xlu1 %343  ;;  %v338_v32 = vpop.xlane.xlu0 %337 }
 0x163   : > { %371 = vst.msk [vmem:[%s213_s4 + $0x10] sm:$0xff] %vm368_vm2, %v344_v31  ;;  %369 = vst.msk [vmem:[%s213_s4] sm:$0xff] %vm368_vm2, %v338_v32 }
 0x166   : > { %v347_v33 = vpop.xlane.xlu1 %346  ;;  %v358_v34 = vpop.xlane.xlu0 %357 }
 0x167   : > { %372 = vst.msk [vmem:[%s213_s4 + $0x18] sm:$0xff] %vm368_vm2, %v347_v33  ;;  %373 = vst.msk [vmem:[%s220_s7] sm:$0xff] %vm368_vm2, %v358_v34 }
 0x16a   : > { %v361_v35 = vpop.xlane.xlu1 %360  ;;  %v341_v36 = vpop.xlane.xlu0 %340 }
 0x16b   : > { %374 = vst.msk [vmem:[%s220_s7 + $0x8] sm:$0xff] %vm368_vm2, %v361_v35  ;;  %370 = vst.msk [vmem:[%s213_s4 + $0x8] sm:$0xff] %vm368_vm2, %v341_v36 }
 0x16e   : > { %v367_v37 = vpop.xlane.xlu1 %366  ;;  %v364_v38 = vpop.xlane.xlu0 %363 }
 0x16f   : > { %376 = vst.msk [vmem:[%s220_s7 + $0x18] sm:$0xff] %vm368_vm2, %v367_v37  ;;  %375 = vst.msk [vmem:[%s220_s7 + $0x10] sm:$0xff] %vm368_vm2, %v364_v38 }
 0x170 PF: > { %s14_s14 = sadd.s32 1, %s558_s14   ;;  %s645_s12 = smov %s554_s13 }
 0x171   : > { %p11_p5 = scmp.ge.s32.totalorder %s14_s14, 4   ;;  %s646_s13 = smov %s648_s15 }
 0x173   :  { %13 = sbr.rel (!%p11_p5) target bundleno = 2 (0x2), region = 70 }

</bundles_post_ra>
